<compile_context>
chip_gen: v7x
topology: tpu7x:2x2x1
jax: 0.10.0
libtpu: 0.0.40
codegen_flags: <defaults>
</compile_context>

<pallas_src>
import jax
import jax.numpy as jnp
from jax import lax
from jax.experimental import pallas as pl
from jax.experimental.pallas import tpu as pltpu

LN_EPS = 1e-5     # PyTorch nn.LayerNorm default
AT = 4            # number of answer types
AT_PAD = 128      # lane-dense padded width of the answer-type head


def _round_up(x, m):
    return (x + m - 1) // m * m


def _make_vqa_kernel(d_total):
    """d_total = D_img + D_txt, the joint LayerNorm feature count (static)."""

    inv_d = 1.0 / float(d_total)

    def kernel(
        img_ref, q_ref,                 # (TB, D_img) f32, (TB, D_txt) f32
        ln1_gi_ref, ln1_bi_ref,         # (1, D_img) f32
        ln1_gq_ref, ln1_bq_ref,         # (1, D_txt) f32
        w1i_ref, w1q_ref, b1_ref,       # (D_img, H) bf16, (D_txt, H) bf16, (1, H) f32
        wt_ref, bt_ref,                 # (H, AT_PAD) bf16, (1, AT_PAD) f32
        wm_ref, bm_ref,                 # (AT_PAD, C_pad) bf16, (1, C_pad) f32
        ln2_g_ref, ln2_b_ref,           # (1, H) f32
        w2_ref, b2_ref,                 # (H, C_pad) bf16, (1, C_pad) f32
        out_ref,                        # (TB, C_pad) f32
        atype_ref,                      # (TB, AT_PAD) f32
    ):
        img = img_ref[...].astype(jnp.float32)
        q = q_ref[...].astype(jnp.float32)

        # ---- joint LayerNorm over cat(img, q) without materializing the concat
        mean = (jnp.sum(img, axis=-1, keepdims=True)
                + jnp.sum(q, axis=-1, keepdims=True)) * inv_d
        ci = img - mean
        cq = q - mean
        var = (jnp.sum(ci * ci, axis=-1, keepdims=True)
               + jnp.sum(cq * cq, axis=-1, keepdims=True)) * inv_d
        inv_std = lax.rsqrt(var + LN_EPS)
        img_n = ci * inv_std * ln1_gi_ref[...] + ln1_bi_ref[...]
        q_n = cq * inv_std * ln1_gq_ref[...] + ln1_bq_ref[...]

        # ---- linear_layer1 (Dropout identity in eval); bf16 MXU, f32 accumulation
        h = (jnp.dot(img_n.astype(jnp.bfloat16), w1i_ref[...],
                     preferred_element_type=jnp.float32)
             + jnp.dot(q_n.astype(jnp.bfloat16), w1q_ref[...],
                       preferred_element_type=jnp.float32)
             + b1_ref[...])
        h_bf = h.astype(jnp.bfloat16)

        # ---- answer_type_layer (128-lane padded; padded columns of Wt/bt are zero)
        atype = jnp.dot(h_bf, wt_ref[...],
                        preferred_element_type=jnp.float32) + bt_ref[...]

        # ---- answer_mask_layer + sigmoid (padded rows of Wm are zero)
        amask = jax.nn.sigmoid(
            jnp.dot(atype.astype(jnp.bfloat16), wm_ref[...],
                    preferred_element_type=jnp.float32) + bm_ref[...])

        # ---- linear_layer2: LayerNorm(H) -> Linear(H, C_pad)
        h_mean = jnp.mean(h, axis=-1, keepdims=True)
        hc = h - h_mean
        h_var = jnp.mean(hc * hc, axis=-1, keepdims=True)
        hn = hc * lax.rsqrt(h_var + LN_EPS) * ln2_g_ref[...] + ln2_b_ref[...]
        logits = jnp.dot(hn.astype(jnp.bfloat16), w2_ref[...],
                         preferred_element_type=jnp.float32) + b2_ref[...]

        out_ref[...] = logits * amask
        atype_ref[...] = atype

    return kernel


def vqa_forward(image, question, params, *, batch_tile=None):
    """image: (B, D_img), question: (B, D_txt).

    Returns (output (B, C), answer_type (B, 4))."""
    image = image.reshape(image.shape[0], -1).astype(jnp.float32)
    question = question.reshape(question.shape[0], -1).astype(jnp.float32)

    B, d_img = image.shape
    _, d_txt = question.shape
    d_total = d_img + d_txt
    H = params["w1"].shape[1]
    C = params["w2"].shape[1]
    c_pad = _round_up(C, 128)

    # batch tile: multiple of 8 sublanes, large enough to amortize per-step overhead
    if batch_tile is None:
        batch_tile = min(256, _round_up(B, 8))
    tb = max(8, _round_up(batch_tile, 8))
    b_pad = _round_up(B, tb)
    if b_pad != B:
        image = jnp.pad(image, ((0, b_pad - B), (0, 0)))
        question = jnp.pad(question, ((0, b_pad - B), (0, 0)))

    f32, bf16 = jnp.float32, jnp.bfloat16

    def pad2(a, rows, cols, dtype):
        a = a.astype(dtype)
        return jnp.pad(a, ((0, rows - a.shape[0]), (0, cols - a.shape[1])))

    ln1_g = params["ln1_g"].reshape(1, d_total).astype(f32)
    ln1_b = params["ln1_b"].reshape(1, d_total).astype(f32)
    w1 = params["w1"]

    inputs = (
        image, question,
        ln1_g[:, :d_img], ln1_b[:, :d_img],
        ln1_g[:, d_img:], ln1_b[:, d_img:],
        w1[:d_img].astype(bf16), w1[d_img:].astype(bf16),
        params["b1"].reshape(1, H).astype(f32),
        pad2(params["wt"], H, AT_PAD, bf16),
        pad2(params["bt"].reshape(1, AT), 1, AT_PAD, f32),
        pad2(params["wm"], AT_PAD, c_pad, bf16),
        pad2(params["bm"].reshape(1, C), 1, c_pad, f32),
        params["ln2_g"].reshape(1, H).astype(f32),
        params["ln2_b"].reshape(1, H).astype(f32),
        pad2(params["w2"], H, c_pad, bf16),
        pad2(params["b2"].reshape(1, C), 1, c_pad, f32),
    )

    def batch_spec(cols):
        return pl.BlockSpec((tb, cols), lambda i: (i, 0))

    def resident_spec(shape):
        # same block every grid step -> stays VMEM-resident across batch tiles
        return pl.BlockSpec(shape, lambda i: (0, 0))

    in_specs = [batch_spec(d_img), batch_spec(d_txt)]
    in_specs += [resident_spec(a.shape) for a in inputs[2:]]

    # advisory cost estimate for XLA scheduling around the custom call
    flops = 2 * b_pad * (d_total * H + H * AT_PAD + AT_PAD * c_pad + H * c_pad)
    bytes_accessed = int(
        b_pad * d_total * 4 + b_pad * (c_pad + AT_PAD) * 4
        + sum(int(a.size) * a.dtype.itemsize for a in inputs[2:]))
    transcendentals = int(b_pad * c_pad + 2 * b_pad)

    out_pad, atype_pad = pl.pallas_call(
        _make_vqa_kernel(d_total),
        out_shape=(
            jax.ShapeDtypeStruct((b_pad, c_pad), f32),
            jax.ShapeDtypeStruct((b_pad, AT_PAD), f32),
        ),
        grid=(b_pad // tb,),
        in_specs=in_specs,
        out_specs=(batch_spec(c_pad), batch_spec(AT_PAD)),
        compiler_params=pltpu.CompilerParams(
            dimension_semantics=("parallel",),       # shards batch tiles across TCs on v7x
            vmem_limit_bytes=64 * 1024 * 1024,
        ),
        cost_estimate=pl.CostEstimate(
            flops=int(flops), transcendentals=transcendentals,
            bytes_accessed=bytes_accessed),
    )(*inputs)

    return out_pad[:B, :C], atype_pad[:B, :AT]


def init_params(key, feat_dim, hidden_size, num_classes):
    """Deterministic parameter init matching the shapes in VQAModel.__init__."""
    ks = jax.random.split(key, 6)
    s = 0.02
    return {
        # linear_layer1 = LayerNorm(feat_dim) + Dropout + Linear(feat_dim, hidden)
        "ln1_g": jnp.ones((1, feat_dim), jnp.float32),
        "ln1_b": jnp.zeros((1, feat_dim), jnp.float32),
        "w1": (s * jax.random.normal(ks[0], (feat_dim, hidden_size))).astype(jnp.float32),
        "b1": jnp.zeros((1, hidden_size), jnp.float32),
        # answer_type_layer = Linear(hidden, 4)
        "wt": (s * jax.random.normal(ks[1], (hidden_size, AT))).astype(jnp.float32),
        "bt": (s * jax.random.normal(ks[2], (1, AT))).astype(jnp.float32),
        # answer_mask_layer = Linear(4, num_classes)
        "wm": (s * jax.random.normal(ks[3], (AT, num_classes))).astype(jnp.float32),
        "bm": jnp.zeros((1, num_classes), jnp.float32),
        # linear_layer2 = LayerNorm(hidden) + Dropout + Linear(hidden, num_classes)
        "ln2_g": jnp.ones((1, hidden_size), jnp.float32),
        "ln2_b": jnp.zeros((1, hidden_size), jnp.float32),
        "w2": (s * jax.random.normal(ks[4], (hidden_size, num_classes))).astype(jnp.float32),
        "b2": jnp.zeros((1, num_classes), jnp.float32),
    }


def _reference_forward(image, question, p):
    """Pure-JAX reference (same bf16-input / f32-accumulate matmul convention)."""
    feat = jnp.concatenate(
        [image.reshape(image.shape[0], -1),
         question.reshape(question.shape[0], -1)], axis=1).astype(jnp.float32)

    def ln(x, g, b):
        m = jnp.mean(x, axis=-1, keepdims=True)
        v = jnp.mean((x - m) ** 2, axis=-1, keepdims=True)
        return (x - m) * lax.rsqrt(v + LN_EPS) * g + b

    def mm(x, w):
        return jnp.dot(x.astype(jnp.bfloat16), w.astype(jnp.bfloat16),
                       preferred_element_type=jnp.float32)

    xn = ln(feat, p["ln1_g"], p["ln1_b"])
    h = mm(xn, p["w1"]) + p["b1"]
    at = mm(h, p["wt"]) + p["bt"]
    am = jax.nn.sigmoid(mm(at, p["wm"]) + p["bm"])
    hn = ln(h, p["ln2_g"], p["ln2_b"])
    out = (mm(hn, p["w2"]) + p["b2"]) * am
    return out, at


if __name__ == "__main__":
    # Small synthetic shapes consistent with the forward pass:
    #   image features (B, D_img), question features (B, D_txt)
    B, D_IMG, D_TXT = 16, 64, 64
    HIDDEN, NUM_CLASSES = 64, 48
    FEAT_DIM = D_IMG + D_TXT

    key = jax.random.PRNGKey(0)
    k_img, k_q, k_p = jax.random.split(key, 3)
    image = jax.random.normal(k_img, (B, D_IMG), dtype=jnp.float32)
    question = jax.random.normal(k_q, (B, D_TXT), dtype=jnp.float32)
    params = init_params(k_p, FEAT_DIM, HIDDEN, NUM_CLASSES)

    out, answer_type = vqa_forward(image, question, params)
    jax.block_until_ready((out, answer_type))

    # correctness check against pure-JAX reference (same bf16 matmul convention)
    ref_out, ref_at = _reference_forward(image, question, params)
    assert out.shape == (B, NUM_CLASSES) and answer_type.shape == (B, AT)
    assert jnp.allclose(out, ref_out, atol=2e-3, rtol=2e-3)
    assert jnp.allclose(answer_type, ref_at, atol=2e-3, rtol=2e-3)

    print("KERNEL_OK")
</pallas_src>

<mosaic_0001>
module attributes {stable_mosaic.version = 11 : i64} {
  func.func @kernel(%arg0: i32, %arg1: memref<16x64xf32, #tpu.memory_space<vmem>>, %arg2: memref<16x64xf32, #tpu.memory_space<vmem>>, %arg3: memref<1x64xf32, #tpu.memory_space<vmem>>, %arg4: memref<1x64xf32, #tpu.memory_space<vmem>>, %arg5: memref<1x64xf32, #tpu.memory_space<vmem>>, %arg6: memref<1x64xf32, #tpu.memory_space<vmem>>, %arg7: memref<64x64xbf16, #tpu.memory_space<vmem>>, %arg8: memref<64x64xbf16, #tpu.memory_space<vmem>>, %arg9: memref<1x64xf32, #tpu.memory_space<vmem>>, %arg10: memref<64x128xbf16, #tpu.memory_space<vmem>>, %arg11: memref<1x128xf32, #tpu.memory_space<vmem>>, %arg12: memref<128x128xbf16, #tpu.memory_space<vmem>>, %arg13: memref<1x128xf32, #tpu.memory_space<vmem>>, %arg14: memref<1x64xf32, #tpu.memory_space<vmem>>, %arg15: memref<1x64xf32, #tpu.memory_space<vmem>>, %arg16: memref<64x128xbf16, #tpu.memory_space<vmem>>, %arg17: memref<1x128xf32, #tpu.memory_space<vmem>>, %arg18: memref<16x128xf32, #tpu.memory_space<vmem>>, %arg19: memref<16x128xf32, #tpu.memory_space<vmem>>) attributes {dimension_semantics = [#tpu.dimension_semantics<parallel>], iteration_bounds = array<i64: 1>, scalar_prefetch = 0 : i64, scratch_operands = 0 : i64, tpu.core_type = #tpu.core_type<tc>, window_params = [{transform_indices = @transform_0, window_bounds = array<i64: 16, 64>}, {transform_indices = @transform_1, window_bounds = array<i64: 16, 64>}, {pipeline_mode = #tpu.pipeline_mode<synchronous>, transform_indices = @transform_2, window_bounds = array<i64: 1, 64>}, {pipeline_mode = #tpu.pipeline_mode<synchronous>, transform_indices = @transform_3, window_bounds = array<i64: 1, 64>}, {pipeline_mode = #tpu.pipeline_mode<synchronous>, transform_indices = @transform_4, window_bounds = array<i64: 1, 64>}, {pipeline_mode = #tpu.pipeline_mode<synchronous>, transform_indices = @transform_5, window_bounds = array<i64: 1, 64>}, {pipeline_mode = #tpu.pipeline_mode<synchronous>, transform_indices = @transform_6, window_bounds = array<i64: 64, 64>}, {pipeline_mode = #tpu.pipeline_mode<synchronous>, transform_indices = @transform_7, window_bounds = array<i64: 64, 64>}, {pipeline_mode = #tpu.pipeline_mode<synchronous>, transform_indices = @transform_8, window_bounds = array<i64: 1, 64>}, {pipeline_mode = #tpu.pipeline_mode<synchronous>, transform_indices = @transform_9, window_bounds = array<i64: 64, 128>}, {pipeline_mode = #tpu.pipeline_mode<synchronous>, transform_indices = @transform_10, window_bounds = array<i64: 1, 128>}, {pipeline_mode = #tpu.pipeline_mode<synchronous>, transform_indices = @transform_11, window_bounds = array<i64: 128, 128>}, {pipeline_mode = #tpu.pipeline_mode<synchronous>, transform_indices = @transform_12, window_bounds = array<i64: 1, 128>}, {pipeline_mode = #tpu.pipeline_mode<synchronous>, transform_indices = @transform_13, window_bounds = array<i64: 1, 64>}, {pipeline_mode = #tpu.pipeline_mode<synchronous>, transform_indices = @transform_14, window_bounds = array<i64: 1, 64>}, {pipeline_mode = #tpu.pipeline_mode<synchronous>, transform_indices = @transform_15, window_bounds = array<i64: 64, 128>}, {pipeline_mode = #tpu.pipeline_mode<synchronous>, transform_indices = @transform_16, window_bounds = array<i64: 1, 128>}, {transform_indices = @transform_17, window_bounds = array<i64: 16, 128>}, {transform_indices = @transform_18, window_bounds = array<i64: 16, 128>}]} {
    %c0 = arith.constant 0 : index
    %c0_0 = arith.constant 0 : index
    %0 = vector.load %arg1[%c0, %c0_0] : memref<16x64xf32, #tpu.memory_space<vmem>>, vector<16x64xf32>
    %c0_1 = arith.constant 0 : index
    %c0_2 = arith.constant 0 : index
    %1 = vector.load %arg2[%c0_1, %c0_2] : memref<16x64xf32, #tpu.memory_space<vmem>>, vector<16x64xf32>
    %cst = arith.constant dense<0.000000e+00> : vector<16xf32>
    %2 = vector.multi_reduction <add>, %0, %cst [1] : vector<16x64xf32> to vector<16xf32>
    %3 = vector.shape_cast %2 : vector<16xf32> to vector<16x1xf32>
    %cst_3 = arith.constant dense<0.000000e+00> : vector<16xf32>
    %4 = vector.multi_reduction <add>, %1, %cst_3 [1] : vector<16x64xf32> to vector<16xf32>
    %5 = vector.shape_cast %4 : vector<16xf32> to vector<16x1xf32>
    %6 = arith.addf %3, %5 : vector<16x1xf32>
    %cst_4 = arith.constant 7.812500e-03 : f32
    %7 = vector.broadcast %cst_4 : f32 to vector<16x1xf32>
    %8 = arith.mulf %6, %7 : vector<16x1xf32>
    %9 = vector.broadcast %8 : vector<16x1xf32> to vector<16x64xf32>
    %10 = arith.subf %0, %9 : vector<16x64xf32>
    %11 = vector.broadcast %8 : vector<16x1xf32> to vector<16x64xf32>
    %12 = arith.subf %1, %11 : vector<16x64xf32>
    %13 = arith.mulf %10, %10 : vector<16x64xf32>
    %cst_5 = arith.constant dense<0.000000e+00> : vector<16xf32>
    %14 = vector.multi_reduction <add>, %13, %cst_5 [1] : vector<16x64xf32> to vector<16xf32>
    %15 = vector.shape_cast %14 : vector<16xf32> to vector<16x1xf32>
    %16 = arith.mulf %12, %12 : vector<16x64xf32>
    %cst_6 = arith.constant dense<0.000000e+00> : vector<16xf32>
    %17 = vector.multi_reduction <add>, %16, %cst_6 [1] : vector<16x64xf32> to vector<16xf32>
    %18 = vector.shape_cast %17 : vector<16xf32> to vector<16x1xf32>
    %19 = arith.addf %15, %18 : vector<16x1xf32>
    %cst_7 = arith.constant 7.812500e-03 : f32
    %20 = vector.broadcast %cst_7 : f32 to vector<16x1xf32>
    %21 = arith.mulf %19, %20 : vector<16x1xf32>
    %cst_8 = arith.constant 9.99999974E-6 : f32
    %22 = vector.broadcast %cst_8 : f32 to vector<16x1xf32>
    %23 = arith.addf %21, %22 : vector<16x1xf32>
    %24 = math.rsqrt %23 : vector<16x1xf32>
    %25 = vector.broadcast %24 : vector<16x1xf32> to vector<16x64xf32>
    %26 = arith.mulf %10, %25 : vector<16x64xf32>
    %c0_9 = arith.constant 0 : index
    %c0_10 = arith.constant 0 : index
    %27 = vector.load %arg3[%c0_9, %c0_10] : memref<1x64xf32, #tpu.memory_space<vmem>>, vector<1x64xf32>
    %28 = vector.broadcast %27 : vector<1x64xf32> to vector<16x64xf32>
    %29 = arith.mulf %26, %28 : vector<16x64xf32>
    %c0_11 = arith.constant 0 : index
    %c0_12 = arith.constant 0 : index
    %30 = vector.load %arg4[%c0_11, %c0_12] : memref<1x64xf32, #tpu.memory_space<vmem>>, vector<1x64xf32>
    %31 = vector.broadcast %30 : vector<1x64xf32> to vector<16x64xf32>
    %32 = arith.addf %29, %31 : vector<16x64xf32>
    %33 = vector.broadcast %24 : vector<16x1xf32> to vector<16x64xf32>
    %34 = arith.mulf %12, %33 : vector<16x64xf32>
    %c0_13 = arith.constant 0 : index
    %c0_14 = arith.constant 0 : index
    %35 = vector.load %arg5[%c0_13, %c0_14] : memref<1x64xf32, #tpu.memory_space<vmem>>, vector<1x64xf32>
    %36 = vector.broadcast %35 : vector<1x64xf32> to vector<16x64xf32>
    %37 = arith.mulf %34, %36 : vector<16x64xf32>
    %c0_15 = arith.constant 0 : index
    %c0_16 = arith.constant 0 : index
    %38 = vector.load %arg6[%c0_15, %c0_16] : memref<1x64xf32, #tpu.memory_space<vmem>>, vector<1x64xf32>
    %39 = vector.broadcast %38 : vector<1x64xf32> to vector<16x64xf32>
    %40 = arith.addf %37, %39 : vector<16x64xf32>
    %41 = arith.truncf %32 : vector<16x64xf32> to vector<16x64xbf16>
    %c0_17 = arith.constant 0 : index
    %c0_18 = arith.constant 0 : index
    %42 = vector.load %arg7[%c0_17, %c0_18] : memref<64x64xbf16, #tpu.memory_space<vmem>>, vector<64x64xbf16>
    %cst_19 = arith.constant dense<0.000000e+00> : vector<16x64xf32>
    %43 = tpu.matmul %41, %42, %cst_19 {dimension_numbers = #tpu.dot_dimension_numbers<[1], [0], [0], [1], [0, 0, 1, 1], [], []>} : vector<16x64xbf16>, vector<64x64xbf16>, vector<16x64xf32> -> vector<16x64xf32>
    %44 = arith.truncf %40 : vector<16x64xf32> to vector<16x64xbf16>
    %c0_20 = arith.constant 0 : index
    %c0_21 = arith.constant 0 : index
    %45 = vector.load %arg8[%c0_20, %c0_21] : memref<64x64xbf16, #tpu.memory_space<vmem>>, vector<64x64xbf16>
    %cst_22 = arith.constant dense<0.000000e+00> : vector<16x64xf32>
    %46 = tpu.matmul %44, %45, %cst_22 {dimension_numbers = #tpu.dot_dimension_numbers<[1], [0], [0], [1], [0, 0, 1, 1], [], []>} : vector<16x64xbf16>, vector<64x64xbf16>, vector<16x64xf32> -> vector<16x64xf32>
    %47 = arith.addf %43, %46 : vector<16x64xf32>
    %c0_23 = arith.constant 0 : index
    %c0_24 = arith.constant 0 : index
    %48 = vector.load %arg9[%c0_23, %c0_24] : memref<1x64xf32, #tpu.memory_space<vmem>>, vector<1x64xf32>
    %49 = vector.broadcast %48 : vector<1x64xf32> to vector<16x64xf32>
    %50 = arith.addf %47, %49 : vector<16x64xf32>
    %51 = arith.truncf %50 : vector<16x64xf32> to vector<16x64xbf16>
    %c0_25 = arith.constant 0 : index
    %c0_26 = arith.constant 0 : index
    %52 = vector.load %arg10[%c0_25, %c0_26] : memref<64x128xbf16, #tpu.memory_space<vmem>>, vector<64x128xbf16>
    %cst_27 = arith.constant dense<0.000000e+00> : vector<16x128xf32>
    %53 = tpu.matmul %51, %52, %cst_27 {dimension_numbers = #tpu.dot_dimension_numbers<[1], [0], [0], [1], [0, 0, 1, 1], [], []>} : vector<16x64xbf16>, vector<64x128xbf16>, vector<16x128xf32> -> vector<16x128xf32>
    %c0_28 = arith.constant 0 : index
    %c0_29 = arith.constant 0 : index
    %54 = vector.load %arg11[%c0_28, %c0_29] : memref<1x128xf32, #tpu.memory_space<vmem>>, vector<1x128xf32>
    %55 = vector.broadcast %54 : vector<1x128xf32> to vector<16x128xf32>
    %56 = arith.addf %53, %55 : vector<16x128xf32>
    %57 = arith.truncf %56 : vector<16x128xf32> to vector<16x128xbf16>
    %c0_30 = arith.constant 0 : index
    %c0_31 = arith.constant 0 : index
    %58 = vector.load %arg12[%c0_30, %c0_31] : memref<128x128xbf16, #tpu.memory_space<vmem>>, vector<128x128xbf16>
    %cst_32 = arith.constant dense<0.000000e+00> : vector<16x128xf32>
    %59 = tpu.matmul %57, %58, %cst_32 {dimension_numbers = #tpu.dot_dimension_numbers<[1], [0], [0], [1], [0, 0, 1, 1], [], []>} : vector<16x128xbf16>, vector<128x128xbf16>, vector<16x128xf32> -> vector<16x128xf32>
    %c0_33 = arith.constant 0 : index
    %c0_34 = arith.constant 0 : index
    %60 = vector.load %arg13[%c0_33, %c0_34] : memref<1x128xf32, #tpu.memory_space<vmem>>, vector<1x128xf32>
    %61 = vector.broadcast %60 : vector<1x128xf32> to vector<16x128xf32>
    %62 = arith.addf %59, %61 : vector<16x128xf32>
    %63 = arith.negf %62 : vector<16x128xf32>
    %64 = math.exp %63 : vector<16x128xf32>
    %cst_35 = arith.constant 1.000000e+00 : f32
    %65 = vector.broadcast %cst_35 : f32 to vector<16x128xf32>
    %66 = arith.addf %65, %64 : vector<16x128xf32>
    %67 = arith.divf %65, %66 : vector<16x128xf32>
    %cst_36 = arith.constant dense<0.000000e+00> : vector<16xf32>
    %68 = vector.multi_reduction <add>, %50, %cst_36 [1] : vector<16x64xf32> to vector<16xf32>
    %69 = vector.shape_cast %68 : vector<16xf32> to vector<16x1xf32>
    %cst_37 = arith.constant 6.400000e+01 : f32
    %70 = vector.broadcast %cst_37 : f32 to vector<16x1xf32>
    %71 = arith.divf %69, %70 : vector<16x1xf32>
    %72 = vector.broadcast %71 : vector<16x1xf32> to vector<16x64xf32>
    %73 = arith.subf %50, %72 : vector<16x64xf32>
    %74 = arith.mulf %73, %73 : vector<16x64xf32>
    %cst_38 = arith.constant dense<0.000000e+00> : vector<16xf32>
    %75 = vector.multi_reduction <add>, %74, %cst_38 [1] : vector<16x64xf32> to vector<16xf32>
    %76 = vector.shape_cast %75 : vector<16xf32> to vector<16x1xf32>
    %cst_39 = arith.constant 6.400000e+01 : f32
    %77 = vector.broadcast %cst_39 : f32 to vector<16x1xf32>
    %78 = arith.divf %76, %77 : vector<16x1xf32>
    %cst_40 = arith.constant 9.99999974E-6 : f32
    %79 = vector.broadcast %cst_40 : f32 to vector<16x1xf32>
    %80 = arith.addf %78, %79 : vector<16x1xf32>
    %81 = math.rsqrt %80 : vector<16x1xf32>
    %82 = vector.broadcast %81 : vector<16x1xf32> to vector<16x64xf32>
    %83 = arith.mulf %73, %82 : vector<16x64xf32>
    %c0_41 = arith.constant 0 : index
    %c0_42 = arith.constant 0 : index
    %84 = vector.load %arg14[%c0_41, %c0_42] : memref<1x64xf32, #tpu.memory_space<vmem>>, vector<1x64xf32>
    %85 = vector.broadcast %84 : vector<1x64xf32> to vector<16x64xf32>
    %86 = arith.mulf %83, %85 : vector<16x64xf32>
    %c0_43 = arith.constant 0 : index
    %c0_44 = arith.constant 0 : index
    %87 = vector.load %arg15[%c0_43, %c0_44] : memref<1x64xf32, #tpu.memory_space<vmem>>, vector<1x64xf32>
    %88 = vector.broadcast %87 : vector<1x64xf32> to vector<16x64xf32>
    %89 = arith.addf %86, %88 : vector<16x64xf32>
    %90 = arith.truncf %89 : vector<16x64xf32> to vector<16x64xbf16>
    %c0_45 = arith.constant 0 : index
    %c0_46 = arith.constant 0 : index
    %91 = vector.load %arg16[%c0_45, %c0_46] : memref<64x128xbf16, #tpu.memory_space<vmem>>, vector<64x128xbf16>
    %cst_47 = arith.constant dense<0.000000e+00> : vector<16x128xf32>
    %92 = tpu.matmul %90, %91, %cst_47 {dimension_numbers = #tpu.dot_dimension_numbers<[1], [0], [0], [1], [0, 0, 1, 1], [], []>} : vector<16x64xbf16>, vector<64x128xbf16>, vector<16x128xf32> -> vector<16x128xf32>
    %c0_48 = arith.constant 0 : index
    %c0_49 = arith.constant 0 : index
    %93 = vector.load %arg17[%c0_48, %c0_49] : memref<1x128xf32, #tpu.memory_space<vmem>>, vector<1x128xf32>
    %94 = vector.broadcast %93 : vector<1x128xf32> to vector<16x128xf32>
    %95 = arith.addf %92, %94 : vector<16x128xf32>
    %96 = arith.mulf %95, %67 : vector<16x128xf32>
    %c0_50 = arith.constant 0 : index
    %c0_51 = arith.constant 0 : index
    %97 = vector.load %arg18[%c0_50, %c0_51] : memref<16x128xf32, #tpu.memory_space<vmem>>, vector<16x128xf32>
    tpu.vector_store %arg18[%c0_50, %c0_51], %96 {strides = array<i32>} : memref<16x128xf32, #tpu.memory_space<vmem>>, vector<16x128xf32>,
    %c0_52 = arith.constant 0 : index
    %c0_53 = arith.constant 0 : index
    %98 = vector.load %arg19[%c0_52, %c0_53] : memref<16x128xf32, #tpu.memory_space<vmem>>, vector<16x128xf32>
    tpu.vector_store %arg19[%c0_52, %c0_53], %56 {strides = array<i32>} : memref<16x128xf32, #tpu.memory_space<vmem>>, vector<16x128xf32>,
    return
  }
  func.func @transform_0(%arg0: i32) -> (i32, i32) {
    %c0_i32 = arith.constant 0 : i32
    %c0_i32_0 = arith.constant 0 : i32
    return %arg0, %c0_i32 : i32, i32
  }
  func.func @transform_1(%arg0: i32) -> (i32, i32) {
    %c0_i32 = arith.constant 0 : i32
    %c0_i32_0 = arith.constant 0 : i32
    return %arg0, %c0_i32 : i32, i32
  }
  func.func @transform_2(%arg0: i32) -> (i32, i32) {
    %c0_i32 = arith.constant 0 : i32
    %c0_i32_0 = arith.constant 0 : i32
    %c0_i32_1 = arith.constant 0 : i32
    return %c0_i32, %c0_i32_0 : i32, i32
  }
  func.func @transform_3(%arg0: i32) -> (i32, i32) {
    %c0_i32 = arith.constant 0 : i32
    %c0_i32_0 = arith.constant 0 : i32
    %c0_i32_1 = arith.constant 0 : i32
    return %c0_i32, %c0_i32_0 : i32, i32
  }
  func.func @transform_4(%arg0: i32) -> (i32, i32) {
    %c0_i32 = arith.constant 0 : i32
    %c0_i32_0 = arith.constant 0 : i32
    %c0_i32_1 = arith.constant 0 : i32
    return %c0_i32, %c0_i32_0 : i32, i32
  }
  func.func @transform_5(%arg0: i32) -> (i32, i32) {
    %c0_i32 = arith.constant 0 : i32
    %c0_i32_0 = arith.constant 0 : i32
    %c0_i32_1 = arith.constant 0 : i32
    return %c0_i32, %c0_i32_0 : i32, i32
  }
  func.func @transform_6(%arg0: i32) -> (i32, i32) {
    %c0_i32 = arith.constant 0 : i32
    %c0_i32_0 = arith.constant 0 : i32
    %c0_i32_1 = arith.constant 0 : i32
    return %c0_i32, %c0_i32_0 : i32, i32
  }
  func.func @transform_7(%arg0: i32) -> (i32, i32) {
    %c0_i32 = arith.constant 0 : i32
    %c0_i32_0 = arith.constant 0 : i32
    %c0_i32_1 = arith.constant 0 : i32
    return %c0_i32, %c0_i32_0 : i32, i32
  }
  func.func @transform_8(%arg0: i32) -> (i32, i32) {
    %c0_i32 = arith.constant 0 : i32
    %c0_i32_0 = arith.constant 0 : i32
    %c0_i32_1 = arith.constant 0 : i32
    return %c0_i32, %c0_i32_0 : i32, i32
  }
  func.func @transform_9(%arg0: i32) -> (i32, i32) {
    %c0_i32 = arith.constant 0 : i32
    %c0_i32_0 = arith.constant 0 : i32
    %c0_i32_1 = arith.constant 0 : i32
    return %c0_i32, %c0_i32_0 : i32, i32
  }
  func.func @transform_10(%arg0: i32) -> (i32, i32) {
    %c0_i32 = arith.constant 0 : i32
    %c0_i32_0 = arith.constant 0 : i32
    %c0_i32_1 = arith.constant 0 : i32
    return %c0_i32, %c0_i32_0 : i32, i32
  }
  func.func @transform_11(%arg0: i32) -> (i32, i32) {
    %c0_i32 = arith.constant 0 : i32
    %c0_i32_0 = arith.constant 0 : i32
    %c0_i32_1 = arith.constant 0 : i32
    return %c0_i32, %c0_i32_0 : i32, i32
  }
  func.func @transform_12(%arg0: i32) -> (i32, i32) {
    %c0_i32 = arith.constant 0 : i32
    %c0_i32_0 = arith.constant 0 : i32
    %c0_i32_1 = arith.constant 0 : i32
    return %c0_i32, %c0_i32_0 : i32, i32
  }
  func.func @transform_13(%arg0: i32) -> (i32, i32) {
    %c0_i32 = arith.constant 0 : i32
    %c0_i32_0 = arith.constant 0 : i32
    %c0_i32_1 = arith.constant 0 : i32
    return %c0_i32, %c0_i32_0 : i32, i32
  }
  func.func @transform_14(%arg0: i32) -> (i32, i32) {
    %c0_i32 = arith.constant 0 : i32
    %c0_i32_0 = arith.constant 0 : i32
    %c0_i32_1 = arith.constant 0 : i32
    return %c0_i32, %c0_i32_0 : i32, i32
  }
  func.func @transform_15(%arg0: i32) -> (i32, i32) {
    %c0_i32 = arith.constant 0 : i32
    %c0_i32_0 = arith.constant 0 : i32
    %c0_i32_1 = arith.constant 0 : i32
    return %c0_i32, %c0_i32_0 : i32, i32
  }
  func.func @transform_16(%arg0: i32) -> (i32, i32) {
    %c0_i32 = arith.constant 0 : i32
    %c0_i32_0 = arith.constant 0 : i32
    %c0_i32_1 = arith.constant 0 : i32
    return %c0_i32, %c0_i32_0 : i32, i32
  }
  func.func @transform_17(%arg0: i32) -> (i32, i32) {
    %c0_i32 = arith.constant 0 : i32
    %c0_i32_0 = arith.constant 0 : i32
    return %arg0, %c0_i32 : i32, i32
  }
  func.func @transform_18(%arg0: i32) -> (i32, i32) {
    %c0_i32 = arith.constant 0 : i32
    %c0_i32_0 = arith.constant 0 : i32
    return %arg0, %c0_i32 : i32, i32
  }
}

</mosaic_0001>

<bundles_post_ra>
// kernel: tpu_custom_call.1
= control target key start
LH: loop header
LB: loop body
LE: loop exit
PB: predicated region body
PF: predicated region fallthrough
CT: control target
= control target key end

     0   :  { %s1983_s0 = inlined_call_operand.hbm [shape: f32[16,64], index: 0, kind: input, shape index: {}]   ;;  %s1984_s1 = inlined_call_operand.hbm [shape: f32[16,64], index: 1, kind: input, shape index: {}]   ;;  %s1985_s2 = inlined_call_operand.hbm [shape: f32[1,64], index: 2, kind: input, shape index: {}]   ;;  %s1986_s3 = inlined_call_operand.hbm [shape: f32[1,64], index: 3, kind: input, shape index: {}]   ;;  %s1987_s4 = inlined_call_operand.hbm [shape: f32[1,64], index: 4, kind: input, shape index: {}]   ;;  %s1988_s5 = inlined_call_operand.hbm [shape: f32[1,64], index: 5, kind: input, shape index: {}]   ;;  %s1989_s6 = inlined_call_operand.hbm [shape: bf16[64,64], index: 6, kind: input, shape index: {}]   ;;  %s1990_s7 = inlined_call_operand.hbm [shape: bf16[64,64], index: 7, kind: input, shape index: {}]   ;;  %s1991_s8 = inlined_call_operand.hbm [shape: f32[1,64], index: 8, kind: input, shape index: {}]   ;;  %s1992_s9 = inlined_call_operand.hbm [shape: bf16[64,128], index: 9, kind: input, shape index: {}]   ;;  %s1993_s10 = inlined_call_operand.hbm [shape: f32[1,128], index: 10, kind: input, shape index: {}]   ;;  %s1994_s11 = inlined_call_operand.hbm [shape: bf16[128,128], index: 11, kind: input, shape index: {}]   ;;  %s1995_s12 = inlined_call_operand.hbm [shape: f32[1,128], index: 12, kind: input, shape index: {}]   ;;  %s1996_s13 = inlined_call_operand.hbm [shape: f32[1,64], index: 13, kind: input, shape index: {}]   ;;  %s1997_s14 = inlined_call_operand.hbm [shape: f32[1,64], index: 14, kind: input, shape index: {}]   ;;  %s1998_s15 = inlined_call_operand.hbm [shape: bf16[64,128], index: 15, kind: input, shape index: {}]   ;;  %s1999_s16 = inlined_call_operand.hbm [shape: f32[1,128], index: 16, kind: input, shape index: {}]   ;;  %s2000_s17 = inlined_call_operand.hbm [shape: f32[16,128], index: 17, kind: output, shape index: {0}]   ;;  %s2001_s18 = inlined_call_operand.hbm [shape: f32[16,128], index: 18, kind: output, shape index: {1}]  }
   0x1   :  { %2005 = sst [smem:[#allocation43_spill]] %s1983_s0 }
   0x2   :  { %2006 = sst [smem:[#allocation44_spill]] %s1984_s1 }
   0x3   :  { %2007 = sst [smem:[#allocation45_spill]] %s1985_s2 }
   0x4   :  { %24 = vsyncpa [#allocation3], 0 }
   0x5   :  { %25 = vsyncpa [#allocation6], 0 }
   0x6   :  { %26 = vsyncpa [#allocation9], 0 }
   0x7   :  { %27 = vsyncpa [#allocation12], 0 }
   0x8   :  { %28 = vsyncpa [#allocation15], 0 }
   0x9   :  { %29 = vsyncpa [#allocation18], 0 }
   0xa   :  { %30 = vsyncpa [#allocation21], 0 }
   0xb   :  { %31 = vsyncpa [#allocation24], 0 }
   0xc   :  { %32 = vsyncpa [#allocation27], 0 }
   0xd   :  { %33 = vsyncpa [#allocation4], 0 }
   0xe   :  { %34 = vsyncpa [#allocation31], 0  ;;  %s1550_s27 = smov [#allocation5]   ;;  %s1551_s29 = smov [#allocation8]  }
   0xf   :  { %s52_s28 = sshll.u32 %s1550_s27, 4  ;;  %s75_s30 = sshll.u32 %s1551_s29, 4  ;;  %s53_s28 = int_to_ptr.vmem [resolvable:$true] %s52_s28  ;;  %s1670_s30 = int_to_ptr.vmem [resolvable:$true] %s75_s30 }
  0x10   :  { %s2008_s1 = sld [smem:[#allocation44_spill]] }
  0x16   :  { %s1110_s20 = scalar_lea.hbm %s2008_s1, 256 }
  0x17   :  { %p1111_p0 = scmp.ne.s32.totalorder %s2008_s1, %s1110_s20  ;;  %p1114_p1 = scmp.lt.u32.totalorder %s1110_s20, %s2008_s1 }
  0x19   :  { %p1116_p2 = pnand %p1114_p1, %p1111_p0 }
  0x1b   :  { %1119 = shalt.err (!%p1116_p2)
}
  0x1c   :  { %s1120_s24 = scalar_lea.vmem %s53_s28, 256  ;;  %p1125_p4 = scmp.lt.s32.totalorder %s53_s28, %s53_s28 }
  0x1d   :  { %p1121_p3 = scmp.ne.s32.totalorder %s53_s28, %s1120_s24  ;;  %p1126_p5 = scmp.lt.s32.totalorder %s1120_s24, %s1120_s24 }
  0x1f   :  { %p1127_p6 = por %p1126_p5, %p1125_p4 }
  0x21   :  { %p1128_p7 = pnand %p1127_p6, %p1121_p3 }
  0x23   :  { %1131 = shalt.err (!%p1128_p7)
}
  0x24   :  { %s1552_s25 = smov 128   ;;  %s1553_s26 = smov 8  }
  0x25   :  { %58 = dma.hbm_to_vmem [thread:$0]  %s2008_s1, 256, %s53_s28, [#allocation6], %s1552_s25, %s1552_s25, %s1553_s26  }
  0x26   :  { %s1132_s20 = scalar_lea.hbm %s1986_s3, 16 }
  0x27   :  { %p1133_p8 = scmp.ne.s32.totalorder %s1986_s3, %s1132_s20  ;;  %p1136_p9 = scmp.lt.u32.totalorder %s1132_s20, %s1986_s3 }
  0x29   :  { %p1138_p10 = pnand %p1136_p9, %p1133_p8 }
  0x2b   :  { %1141 = shalt.err (!%p1138_p10)
}
  0x2c   :  { %s1142_s24 = scalar_lea.vmem %s1670_s30, 16  ;;  %s1146_s28 = scalar_lea.vmem %s1670_s30, 32 }
  0x2d   :  { %p1143_p11 = scmp.ne.s32.totalorder %s1670_s30, %s1142_s24  ;;  %p1147_p12 = scmp.lt.s32.totalorder %s1670_s30, %s1670_s30 }
  0x2e   :  { %p1148_p13 = scmp.lt.s32.totalorder %s1146_s28, %s1142_s24 }
  0x30   :  { %p1149_p0 = por %p1148_p13, %p1147_p12 }
  0x32   :  { %p1150_p1 = pnand %p1149_p0, %p1143_p11 }
  0x34   :  { %1153 = shalt.err (!%p1150_p1)
}
  0x35   :  { %78 = dma.hbm_to_vmem [thread:$0]  %s1986_s3, 16, %s1670_s30, [#allocation9]  }
  0x36   :  { %s1554_s29 = smov [#allocation11]   ;;  %s1154_s21 = scalar_lea.hbm %s1988_s5, 16 }
  0x37   :  { %s95_s0 = sshll.u32 %s1554_s29, 4  ;;  %p1155_p2 = scmp.ne.s32.totalorder %s1988_s5, %s1154_s21  ;;  %s96_s0 = int_to_ptr.vmem [resolvable:$true] %s95_s0 }
  0x38   :  { %p1158_p3 = scmp.lt.u32.totalorder %s1154_s21, %s1988_s5 }
  0x3a   :  { %p1160_p4 = pnand %p1158_p3, %p1155_p2 }
  0x3c   :  { %1163 = shalt.err (!%p1160_p4)
}
  0x3d   :  { %s1164_s28 = scalar_lea.vmem %s96_s0, 16  ;;  %s1168_s3 = scalar_lea.vmem %s96_s0, 32 }
  0x3e   :  { %p1165_p5 = scmp.ne.s32.totalorder %s96_s0, %s1164_s28  ;;  %p1169_p6 = scmp.lt.s32.totalorder %s96_s0, %s96_s0 }
  0x3f   :  { %p1170_p7 = scmp.lt.s32.totalorder %s1168_s3, %s1164_s28 }
  0x41   :  { %p1171_p8 = por %p1170_p7, %p1169_p6 }
  0x43   :  { %p1172_p9 = pnand %p1171_p8, %p1165_p5 }
  0x45   :  { %1175 = shalt.err (!%p1172_p9)
}
  0x46   :  { %98 = dma.hbm_to_vmem [thread:$0]  %s1988_s5, 16, %s96_s0, [#allocation12]  }
  0x47   :  { %s1555_s27 = smov [#allocation14]   ;;  %s1556_s19 = smov [#allocation17]  }
  0x48   :  { %s116_s29 = sshll.u32 %s1555_s27, 4  ;;  %s138_s20 = sshll.u32 %s1556_s19, 4  ;;  %s117_s29 = int_to_ptr.vmem [resolvable:$true] %s116_s29  ;;  %s139_s20 = int_to_ptr.vmem [resolvable:$true] %s138_s20 }
  0x49   :  { %s1176_s2 = scalar_lea.hbm %s1990_s7, 512 }
  0x4a   :  { %p1177_p10 = scmp.ne.s32.totalorder %s1990_s7, %s1176_s2  ;;  %p1180_p11 = scmp.lt.u32.totalorder %s1176_s2, %s1990_s7 }
  0x4c   :  { %p1182_p12 = pnand %p1180_p11, %p1177_p10 }
  0x4e   :  { %1185 = shalt.err (!%p1182_p12)
}
  0x4f   :  { %s1186_s5 = scalar_lea.vmem %s117_s29, 512  ;;  %p1191_p0 = scmp.lt.s32.totalorder %s117_s29, %s117_s29 }
  0x50   :  { %p1187_p13 = scmp.ne.s32.totalorder %s117_s29, %s1186_s5  ;;  %p1192_p1 = scmp.lt.s32.totalorder %s1186_s5, %s1186_s5 }
  0x52   :  { %p1193_p2 = por %p1192_p1, %p1191_p0 }
  0x54   :  { %p1194_p3 = pnand %p1193_p2, %p1187_p13 }
  0x56   :  { %1197 = shalt.err (!%p1194_p3)
}
  0x57   :  { %s1557_s0 = smov 64   ;;  %s1558_s30 = smov 4  }
  0x58   :  { %122 = dma.hbm_to_vmem [thread:$0]  %s1990_s7, 512, %s117_s29, [#allocation15], %s1557_s0, %s1557_s0, %s1558_s30  }
  0x59   :  { %s1198_s22 = scalar_lea.hbm %s1992_s9, 512 }
  0x5a   :  { %p1199_p4 = scmp.ne.s32.totalorder %s1992_s9, %s1198_s22  ;;  %p1202_p5 = scmp.lt.u32.totalorder %s1198_s22, %s1992_s9 }
  0x5c   :  { %p1204_p6 = pnand %p1202_p5, %p1199_p4 }
  0x5e   :  { %1207 = shalt.err (!%p1204_p6)
}
  0x5f   :  { %s1208_s3 = scalar_lea.vmem %s139_s20, 512  ;;  %p1213_p8 = scmp.lt.s32.totalorder %s139_s20, %s139_s20 }
  0x60   :  { %p1209_p7 = scmp.ne.s32.totalorder %s139_s20, %s1208_s3  ;;  %p1214_p9 = scmp.lt.s32.totalorder %s1208_s3, %s1208_s3 }
  0x62   :  { %p1215_p10 = por %p1214_p9, %p1213_p8 }
  0x64   :  { %p1216_p11 = pnand %p1215_p10, %p1209_p7 }
  0x66   :  { %1219 = shalt.err (!%p1216_p11)
}
  0x67   :  { %144 = dma.hbm_to_vmem [thread:$0]  %s1992_s9, 512, %s139_s20, [#allocation18], %s1557_s0, %s1557_s0, %s1558_s30  }
  0x68   :  { %s1559_s5 = smov [#allocation20]   ;;  %s1560_s27 = smov [#allocation23]  }
  0x69   :  { %s160_s1 = sshll.u32 %s1559_s5, 4  ;;  %s183_s19 = sshll.u32 %s1560_s27, 4  ;;  %s161_s1 = int_to_ptr.vmem [resolvable:$true] %s160_s1  ;;  %s184_s19 = int_to_ptr.vmem [resolvable:$true] %s183_s19 }
  0x6a   :  { %s1220_s2 = scalar_lea.hbm %s1994_s11, 1024 }
  0x6b   :  { %p1221_p12 = scmp.ne.s32.totalorder %s1994_s11, %s1220_s2  ;;  %p1224_p13 = scmp.lt.u32.totalorder %s1220_s2, %s1994_s11 }
  0x6d   :  { %p1226_p0 = pnand %p1224_p13, %p1221_p12 }
  0x6f   :  { %1229 = shalt.err (!%p1226_p0)
}
  0x70   :  { %s1230_s9 = scalar_lea.vmem %s161_s1, 1024  ;;  %p1235_p2 = scmp.lt.s32.totalorder %s161_s1, %s161_s1 }
  0x71   :  { %p1231_p1 = scmp.ne.s32.totalorder %s161_s1, %s1230_s9  ;;  %p1236_p3 = scmp.lt.s32.totalorder %s1230_s9, %s1230_s9 }
  0x73   :  { %p1237_p4 = por %p1236_p3, %p1235_p2 }
  0x75   :  { %p1238_p5 = pnand %p1237_p4, %p1231_p1 }
  0x77   :  { %1241 = shalt.err (!%p1238_p5)
}
  0x78   :  { %166 = dma.hbm_to_vmem [thread:$0]  %s1994_s11, 1024, %s161_s1, [#allocation21], %s1557_s0, %s1557_s0, %s1558_s30  }
  0x79   :  { %s1242_s27 = scalar_lea.hbm %s1996_s13, 16 }
  0x7a   :  { %p1243_p6 = scmp.ne.s32.totalorder %s1996_s13, %s1242_s27  ;;  %p1246_p7 = scmp.lt.u32.totalorder %s1242_s27, %s1996_s13 }
  0x7c   :  { %p1248_p8 = pnand %p1246_p7, %p1243_p6 }
  0x7e   :  { %1251 = shalt.err (!%p1248_p8)
}
  0x7f   :  { %s1252_s24 = scalar_lea.vmem %s184_s19, 16  ;;  %s1256_s28 = scalar_lea.vmem %s184_s19, 32 }
  0x80   :  { %p1253_p9 = scmp.ne.s32.totalorder %s184_s19, %s1252_s24  ;;  %p1257_p10 = scmp.lt.s32.totalorder %s184_s19, %s184_s19 }
  0x81   :  { %p1258_p11 = scmp.lt.s32.totalorder %s1256_s28, %s1252_s24 }
  0x83   :  { %p1259_p12 = por %p1258_p11, %p1257_p10 }
  0x85   :  { %p1260_p13 = pnand %p1259_p12, %p1253_p9 }
  0x87   :  { %1263 = shalt.err (!%p1260_p13)
}
  0x88   :  { %186 = dma.hbm_to_vmem [thread:$0]  %s1996_s13, 16, %s184_s19, [#allocation24]  }
  0x89   :  { %s1561_s3 = smov [#allocation26]   ;;  %s1562_s20 = smov [#allocation2]  }
  0x8a   :  { %s202_s9 = sshll.u32 %s1561_s3, 4  ;;  %s40_s7 = sshll.u32 %s1562_s20, 4  ;;  %s203_s9 = int_to_ptr.vmem [resolvable:$true] %s202_s9  ;;  %s41_s7 = int_to_ptr.vmem [resolvable:$true] %s40_s7 }
  0x8b   :  { %s1264_s27 = scalar_lea.hbm %s1998_s15, 512 }
  0x8c   :  { %p1265_p0 = scmp.ne.s32.totalorder %s1998_s15, %s1264_s27  ;;  %p1268_p1 = scmp.lt.u32.totalorder %s1264_s27, %s1998_s15 }
  0x8e   :  { %p1270_p2 = pnand %p1268_p1, %p1265_p0 }
  0x90   :  { %1273 = shalt.err (!%p1270_p2)
}
  0x91   :  { %s1274_s13 = scalar_lea.vmem %s203_s9, 512  ;;  %p1279_p4 = scmp.lt.s32.totalorder %s203_s9, %s203_s9 }
  0x92   :  { %p1275_p3 = scmp.ne.s32.totalorder %s203_s9, %s1274_s13  ;;  %p1280_p5 = scmp.lt.s32.totalorder %s1274_s13, %s1274_s13 }
  0x94   :  { %p1281_p6 = por %p1280_p5, %p1279_p4 }
  0x96   :  { %p1282_p7 = pnand %p1281_p6, %p1275_p3 }
  0x98   :  { %1285 = shalt.err (!%p1282_p7)
}
  0x99   :  { %208 = dma.hbm_to_vmem [thread:$0]  %s1998_s15, 512, %s203_s9, [#allocation27], %s1557_s0, %s1557_s0, %s1558_s30  }
  0x9a   :  { %s2009_s1 = sld [smem:[#allocation43_spill]] }
  0xa0   :  { %s1286_s3 = scalar_lea.hbm %s2009_s1, 256 }
  0xa1   :  { %p1287_p8 = scmp.ne.s32.totalorder %s2009_s1, %s1286_s3  ;;  %p1290_p9 = scmp.lt.u32.totalorder %s1286_s3, %s2009_s1 }
  0xa3   :  { %p1292_p10 = pnand %p1290_p9, %p1287_p8 }
  0xa5   :  { %1295 = shalt.err (!%p1292_p10)
}
  0xa6   :  { %s1296_s21 = scalar_lea.vmem %s41_s7, 256  ;;  %p1301_p12 = scmp.lt.s32.totalorder %s41_s7, %s41_s7 }
  0xa7   :  { %p1297_p11 = scmp.ne.s32.totalorder %s41_s7, %s1296_s21  ;;  %p1302_p13 = scmp.lt.s32.totalorder %s1296_s21, %s1296_s21 }
  0xa9   :  { %p1303_p0 = por %p1302_p13, %p1301_p12 }
  0xab   :  { %p1304_p1 = pnand %p1303_p0, %p1297_p11 }
  0xad   :  { %1307 = shalt.err (!%p1304_p1)
}
  0xae   :  { %46 = dma.hbm_to_vmem [thread:$0]  %s2009_s1, 256, %s41_s7, [#allocation3], %s1552_s25, %s1552_s25, %s1553_s26  }
  0xaf   :  { %s1563_s22 = smov [#allocation7]   ;;  %s1564_s23 = smov [#allocation10]  }
  0xb0   :  { %s65_s2 = sshll.u32 %s1563_s22, 4  ;;  %s85_s13 = sshll.u32 %s1564_s23, 4  ;;  %s66_s2 = int_to_ptr.vmem [resolvable:$true] %s65_s2  ;;  %s86_s13 = int_to_ptr.vmem [resolvable:$true] %s85_s13 }
  0xb1   :  { %s2010_s28 = sld [smem:[#allocation45_spill]] }
  0xb7   :  { %s1308_s11 = scalar_lea.hbm %s2010_s28, 16 }
  0xb8   :  { %p1309_p2 = scmp.ne.s32.totalorder %s2010_s28, %s1308_s11  ;;  %p1312_p3 = scmp.lt.u32.totalorder %s1308_s11, %s2010_s28 }
  0xba   :  { %p1314_p4 = pnand %p1312_p3, %p1309_p2 }
  0xbc   :  { %1317 = shalt.err (!%p1314_p4)
}
  0xbd   :  { %s1318_s7 = scalar_lea.vmem %s66_s2, 16  ;;  %s1322_s1 = scalar_lea.vmem %s66_s2, 32 }
  0xbe   :  { %p1319_p5 = scmp.ne.s32.totalorder %s66_s2, %s1318_s7  ;;  %p1323_p6 = scmp.lt.s32.totalorder %s66_s2, %s66_s2 }
  0xbf   :  { %p1324_p7 = scmp.lt.s32.totalorder %s1322_s1, %s1318_s7 }
  0xc1   :  { %p1325_p8 = por %p1324_p7, %p1323_p6 }
  0xc3   :  { %p1326_p9 = pnand %p1325_p8, %p1319_p5 }
  0xc5   :  { %1329 = shalt.err (!%p1326_p9)
}
  0xc6   :  { %68 = dma.hbm_to_vmem [thread:$0]  %s2010_s28, 16, %s66_s2, [#allocation6]  }
  0xc7   :  { %s1330_s22 = scalar_lea.hbm %s1987_s4, 16 }
  0xc8   :  { %p1331_p10 = scmp.ne.s32.totalorder %s1987_s4, %s1330_s22  ;;  %p1334_p11 = scmp.lt.u32.totalorder %s1330_s22, %s1987_s4 }
  0xca   :  { %p1336_p12 = pnand %p1334_p11, %p1331_p10 }
  0xcc   :  { %1339 = shalt.err (!%p1336_p12)
}
  0xcd   :  { %s1340_s3 = scalar_lea.vmem %s86_s13, 16  ;;  %s1344_s20 = scalar_lea.vmem %s86_s13, 32 }
  0xce   :  { %p1341_p13 = scmp.ne.s32.totalorder %s86_s13, %s1340_s3  ;;  %p1345_p0 = scmp.lt.s32.totalorder %s86_s13, %s86_s13 }
  0xcf   :  { %p1346_p1 = scmp.lt.s32.totalorder %s1344_s20, %s1340_s3 }
  0xd1   :  { %p1347_p2 = por %p1346_p1, %p1345_p0 }
  0xd3   :  { %p1348_p3 = pnand %p1347_p2, %p1341_p13 }
  0xd5   :  { %1351 = shalt.err (!%p1348_p3)
}
  0xd6   :  { %88 = dma.hbm_to_vmem [thread:$0]  %s1987_s4, 16, %s86_s13, [#allocation9]  }
  0xd7   :  { %s1565_s29 = smov [#allocation13]   ;;  %s1566_s7 = smov [#allocation16]  }
  0xd8   :  { %s104_s5 = sshll.u32 %s1565_s29, 4  ;;  %s129_s1 = sshll.u32 %s1566_s7, 4  ;;  %s105_s5 = int_to_ptr.vmem [resolvable:$true] %s104_s5  ;;  %s130_s1 = int_to_ptr.vmem [resolvable:$true] %s129_s1 }
  0xd9   :  { %s1352_s15 = scalar_lea.hbm %s1989_s6, 512 }
  0xda   :  { %p1353_p4 = scmp.ne.s32.totalorder %s1989_s6, %s1352_s15  ;;  %p1356_p5 = scmp.lt.u32.totalorder %s1352_s15, %s1989_s6 }
  0xdc   :  { %p1358_p6 = pnand %p1356_p5, %p1353_p4 }
  0xde   :  { %1361 = shalt.err (!%p1358_p6)
}
  0xdf   :  { %s1362_s4 = scalar_lea.vmem %s105_s5, 512  ;;  %p1367_p8 = scmp.lt.s32.totalorder %s105_s5, %s105_s5 }
  0xe0   :  { %p1363_p7 = scmp.ne.s32.totalorder %s105_s5, %s1362_s4  ;;  %p1368_p9 = scmp.lt.s32.totalorder %s1362_s4, %s1362_s4 }
  0xe2   :  { %p1369_p10 = por %p1368_p9, %p1367_p8 }
  0xe4   :  { %p1370_p11 = pnand %p1369_p10, %p1363_p7 }
  0xe6   :  { %1373 = shalt.err (!%p1370_p11)
}
  0xe7   :  { %110 = dma.hbm_to_vmem [thread:$0]  %s1989_s6, 512, %s105_s5, [#allocation12], %s1557_s0, %s1557_s0, %s1558_s30  }
  0xe8   :  { %s1374_s20 = scalar_lea.hbm %s1991_s8, 16 }
  0xe9   :  { %p1375_p12 = scmp.ne.s32.totalorder %s1991_s8, %s1374_s20  ;;  %p1378_p13 = scmp.lt.u32.totalorder %s1374_s20, %s1991_s8 }
  0xeb   :  { %p1380_p0 = pnand %p1378_p13, %p1375_p12 }
  0xed   :  { %1383 = shalt.err (!%p1380_p0)
}
  0xee   :  { %s1384_s27 = scalar_lea.vmem %s130_s1, 16  ;;  %s1388_s21 = scalar_lea.vmem %s130_s1, 32 }
  0xef   :  { %p1385_p1 = scmp.ne.s32.totalorder %s130_s1, %s1384_s27  ;;  %p1389_p2 = scmp.lt.s32.totalorder %s130_s1, %s130_s1 }
  0xf0   :  { %p1390_p3 = scmp.lt.s32.totalorder %s1388_s21, %s1384_s27 }
  0xf2   :  { %p1391_p4 = por %p1390_p3, %p1389_p2 }
  0xf4   :  { %p1392_p5 = pnand %p1391_p4, %p1385_p1 }
  0xf6   :  { %1395 = shalt.err (!%p1392_p5)
}
  0xf7   :  { %132 = dma.hbm_to_vmem [thread:$0]  %s1991_s8, 16, %s130_s1, [#allocation15]  }
  0xf8   :  { %s1567_s30 = smov [#allocation19]   ;;  %s1568_s15 = smov [#allocation22]  }
  0xf9   :  { %s151_s5 = sshll.u32 %s1567_s30, 4  ;;  %s173_s9 = sshll.u32 %s1568_s15, 4  ;;  %s152_s5 = int_to_ptr.vmem [resolvable:$true] %s151_s5  ;;  %s174_s9 = int_to_ptr.vmem [resolvable:$true] %s173_s9 }
  0xfa   :  { %s1396_s19 = scalar_lea.hbm %s1993_s10, 16 }
  0xfb   :  { %p1397_p6 = scmp.ne.s32.totalorder %s1993_s10, %s1396_s19  ;;  %p1400_p7 = scmp.lt.u32.totalorder %s1396_s19, %s1993_s10 }
  0xfd   :  { %p1402_p8 = pnand %p1400_p7, %p1397_p6 }
  0xff   :  { %1405 = shalt.err (!%p1402_p8)
}
 0x100   :  { %s1406_s8 = scalar_lea.vmem %s152_s5, 16  ;;  %s1410_s1 = scalar_lea.vmem %s152_s5, 32 }
 0x101   :  { %p1407_p9 = scmp.ne.s32.totalorder %s152_s5, %s1406_s8  ;;  %p1411_p10 = scmp.lt.s32.totalorder %s152_s5, %s152_s5 }
 0x102   :  { %p1412_p11 = scmp.lt.s32.totalorder %s1410_s1, %s1406_s8 }
 0x104   :  { %p1413_p12 = por %p1412_p11, %p1411_p10 }
 0x106   :  { %p1414_p13 = pnand %p1413_p12, %p1407_p9 }
 0x108   :  { %1417 = shalt.err (!%p1414_p13)
}
 0x109   :  { %154 = dma.hbm_to_vmem [thread:$0]  %s1993_s10, 16, %s152_s5, [#allocation18]  }
 0x10a   :  { %s1418_s29 = scalar_lea.hbm %s1995_s12, 16 }
 0x10b   :  { %p1419_p0 = scmp.ne.s32.totalorder %s1995_s12, %s1418_s29  ;;  %p1422_p1 = scmp.lt.u32.totalorder %s1418_s29, %s1995_s12 }
 0x10d   :  { %p1424_p2 = pnand %p1422_p1, %p1419_p0 }
 0x10f   :  { %1427 = shalt.err (!%p1424_p2)
}
 0x110   :  { %s1428_s0 = scalar_lea.vmem %s174_s9, 16  ;;  %s1432_s30 = scalar_lea.vmem %s174_s9, 32 }
 0x111   :  { %p1429_p3 = scmp.ne.s32.totalorder %s174_s9, %s1428_s0  ;;  %p1433_p4 = scmp.lt.s32.totalorder %s174_s9, %s174_s9 }
 0x112   :  { %p1434_p5 = scmp.lt.s32.totalorder %s1432_s30, %s1428_s0 }
 0x114   :  { %p1435_p6 = por %p1434_p5, %p1433_p4 }
 0x116   :  { %p1436_p7 = pnand %p1435_p6, %p1429_p3 }
 0x118   :  { %1439 = shalt.err (!%p1436_p7)
}
 0x119   :  { %176 = dma.hbm_to_vmem [thread:$0]  %s1995_s12, 16, %s174_s9, [#allocation21]  }
 0x11a   :  { %s1569_s15 = smov [#allocation25]   ;;  %s1570_s23 = smov [#allocation28]  }
 0x11b   :  { %s193_s22 = sshll.u32 %s1569_s15, 4  ;;  %s215_s19 = sshll.u32 %s1570_s23, 4  ;;  %s194_s22 = int_to_ptr.vmem [resolvable:$true] %s193_s22  ;;  %s216_s19 = int_to_ptr.vmem [resolvable:$true] %s215_s19 }
 0x11c   :  { %s1440_s24 = scalar_lea.hbm %s1997_s14, 16 }
 0x11d   :  { %p1441_p8 = scmp.ne.s32.totalorder %s1997_s14, %s1440_s24  ;;  %p1444_p9 = scmp.lt.u32.totalorder %s1440_s24, %s1997_s14 }
 0x11f   :  { %p1446_p10 = pnand %p1444_p9, %p1441_p8 }
 0x121   :  { %1449 = shalt.err (!%p1446_p10)
}
 0x122   :  { %s1450_s12 = scalar_lea.vmem %s194_s22, 16  ;;  %s1454_s9 = scalar_lea.vmem %s194_s22, 32 }
 0x123   :  { %p1451_p11 = scmp.ne.s32.totalorder %s194_s22, %s1450_s12  ;;  %p1455_p12 = scmp.lt.s32.totalorder %s194_s22, %s194_s22 }
 0x124   :  { %p1456_p13 = scmp.lt.s32.totalorder %s1454_s9, %s1450_s12 }
 0x126   :  { %p1457_p0 = por %p1456_p13, %p1455_p12 }
 0x128   :  { %p1458_p1 = pnand %p1457_p0, %p1451_p11 }
 0x12a   :  { %1461 = shalt.err (!%p1458_p1)
}
 0x12b   :  { %196 = dma.hbm_to_vmem [thread:$0]  %s1997_s14, 16, %s194_s22, [#allocation24]  }
 0x12c   :  { %s1462_s7 = scalar_lea.hbm %s1999_s16, 16 }
 0x12d   :  { %p1463_p2 = scmp.ne.s32.totalorder %s1999_s16, %s1462_s7  ;;  %p1466_p3 = scmp.lt.u32.totalorder %s1462_s7, %s1999_s16 }
 0x12f   :  { %p1468_p4 = pnand %p1466_p3, %p1463_p2 }
 0x131   :  { %1471 = shalt.err (!%p1468_p4)
}
 0x132   :  { %s1472_s30 = scalar_lea.vmem %s216_s19, 16  ;;  %s1476_s10 = scalar_lea.vmem %s216_s19, 32 }
 0x133   :  { %p1473_p5 = scmp.ne.s32.totalorder %s216_s19, %s1472_s30  ;;  %p1477_p6 = scmp.lt.s32.totalorder %s216_s19, %s216_s19 }
 0x134   :  { %p1478_p7 = scmp.lt.s32.totalorder %s1476_s10, %s1472_s30 }
 0x136   :  { %p1479_p8 = por %p1478_p7, %p1477_p6 }
 0x138   :  { %p1480_p9 = pnand %p1479_p8, %p1473_p5 }
 0x13a   :  { %1483 = shalt.err (!%p1480_p9)
}
 0x13b   :  { %218 = dma.hbm_to_vmem [thread:$0]  %s1999_s16, 16, %s216_s19, [#allocation27]  }
 0x13c   :  { %1528 = dma.done.wait [#allocation3], 256  }
 0x13d   :  { %1529 = vsyncadd [#allocation3], 4294967040 }
 0x13e   :  { %1530 = dma.done.wait [#allocation6], 272  }
 0x13f   :  { %1531 = vsyncadd [#allocation6], 4294967024 }
 0x140   :  { %1532 = dma.done.wait [#allocation9], 32  }
 0x141   :  { %1533 = vsyncadd [#allocation9], 4294967264 }
 0x142   :  { %1534 = dma.done.wait [#allocation12], 528  }
 0x143   :  { %1535 = vsyncadd [#allocation12], 4294966768 }
 0x144   :  { %1536 = dma.done.wait [#allocation15], 528  }
 0x145   :  { %1537 = vsyncadd [#allocation15], 4294966768 }
 0x146   :  { %1538 = dma.done.wait [#allocation18], 528  }
 0x147   :  { %1539 = vsyncadd [#allocation18], 4294966768 }
 0x148   :  { %1540 = dma.done.wait [#allocation21], 1040  }
 0x149   :  { %1541 = vsyncadd [#allocation21], 4294966256 }
 0x14a   :  { %1542 = dma.done.wait [#allocation24], 32  }
 0x14b   :  { %1543 = vsyncadd [#allocation24], 4294967264 }
 0x14c   :  { %1544 = dma.done.wait [#allocation27], 528  }
 0x14d   :  { %1545 = vsyncadd [#allocation27], 4294966768  ;;  %vm275_vm0 = vcmask 523264   ;;  %v273_v0 = vld [vmem:[#allocation5] sm:$0xff]  ;;  %v271_v1 = vld [vmem:[#allocation2] sm:$0xff]  ;;  %v1571_v30 = vmov 0.0  }
 0x14e   :  { %v274_v2 = vld [vmem:[#allocation5 + $0x8] sm:$0xff]  ;;  %v282_v3 = vsel %vm275_vm0, %v273_v0, 0.0  ;;  %v276_v4 = vsel %vm275_vm0, %v271_v1, 0.0  ;;  %v272_v5 = vld [vmem:[#allocation2 + $0x8] sm:$0xff]  ;;  %977 = vmatprep.subr.bf16.mxu0 %v1571_v30  ;;  %989 = vmatprep.subr.bf16.mxu1 %v1571_v30  ;;  %v1072_v31 = vld [vmem:[#allocation14 + $0x8] sm:$0xff]   ;;  %vm1572_vm1 = vmmov 0  }
 0x14f   :  { %283 = vadd.xlane.f32.xlu1 %v282_v3  ;;  %277 = vadd.xlane.f32.xlu0 %v276_v4  ;;  %v285_v6 = vsel %vm275_vm0, %v274_v2, 0.0  ;;  %v279_v7 = vsel %vm275_vm0, %v272_v5, 0.0  ;;  %v1070_v28 = vld [vmem:[#allocation14] sm:$0xff]   ;;  %v1073_v32 = vld [vmem:[#allocation13 + $0x8] sm:$0xff]   ;;  %v1074_v33 = vld [vmem:[#allocation14 + $0x10] sm:$0xff]   ;;  %s1573_s16 = smov [#allocation30]  }
 0x150   :  { %v1071_v29 = vld [vmem:[#allocation13] sm:$0xff]   ;;  %978 = vmatpush3.bf16.msra.mxu0 %v1070_v28  ;;  %v1075_v34 = vld [vmem:[#allocation13 + $0x10] sm:$0xff]   ;;  %v1076_v35 = vld [vmem:[#allocation14 + $0x18] sm:$0xff]   ;;  %985 = vmatprep.mubr.msk.bf16.mxu0 %vm1572_vm1, %v1571_v30  ;;  %s884_s15 = sshll.u32 %s1573_s16, 4  ;;  %s885_s15 = int_to_ptr.vmem [resolvable:$true] %s884_s15 }
 0x151   :  { %990 = vmatpush3.bf16.msra.mxu1 %v1071_v29  ;;  %979 = vmatprep.subr.bf16.mxu0 %v1571_v30  ;;  %v1077_v36 = vld [vmem:[#allocation13 + $0x18] sm:$0xff]   ;;  %v1079_v4 = vld [vmem:[#allocation17 + $0x8] sm:$0xff]   ;;  %s1484_s22 = scalar_lea.vmem %s885_s15, 256  ;;  %p1489_p11 = scmp.lt.s32.totalorder %s885_s15, %s885_s15 }
 0x152   :  { %991 = vmatprep.subr.bf16.mxu1 %v1571_v30  ;;  %997 = vmatprep.mubr.msk.bf16.mxu1 %vm1572_vm1, %v1571_v30  ;;  %v910_v50 = vld [vmem:[#allocation10] ss:$0 sm:$0xff]  ;;  %v908_v51 = vld [vmem:[#allocation7] ss:$0 sm:$0xff]  ;;  %v911_v57 = vld [vmem:[#allocation11] ss:$0 sm:$0xff]  ;;  %p1485_p10 = scmp.ne.s32.totalorder %s885_s15, %s1484_s22  ;;  %p1490_p12 = scmp.lt.s32.totalorder %s1484_s22, %s1484_s22 }
 0x153   :  { %286 = vadd.xlane.f32.xlu1 %v285_v6  ;;  %280 = vadd.xlane.f32.xlu0 %v279_v7  ;;  %v909_v58 = vld [vmem:[#allocation8] ss:$0 sm:$0xff]  ;;  %v1087_v28 = vld [vmem:[#allocation20 + $0x28] sm:$0xff]  }
 0x154   :  { %980 = vmatpush3.bf16.msra.mxu0 %v1072_v31  ;;  %v1081_v6 = vld [vmem:[#allocation17 + $0x18] sm:$0xff]   ;;  %p1491_p13 = por %p1490_p12, %p1489_p11 }
 0x155   :  { %992 = vmatpush3.bf16.msra.mxu1 %v1073_v32  ;;  %981 = vmatprep.subr.bf16.mxu0 %v1571_v30  ;;  %v1088_v29 = vld [vmem:[#allocation20 + $0x30] sm:$0xff]   ;;  %v1089_v31 = vld [vmem:[#allocation20 + $0x38] sm:$0xff]  }
 0x156   :  { %993 = vmatprep.subr.bf16.mxu1 %v1571_v30  ;;  %p1492_p0 = pnand %p1491_p13, %p1485_p10 }
 0x158   :  { %982 = vmatpush3.bf16.msra.mxu0 %v1074_v33 }
 0x159   :  { %994 = vmatpush3.bf16.msra.mxu1 %v1075_v34  ;;  %983 = vmatprep.subr.bf16.mxu0 %v1571_v30 }
 0x15a   :  { %995 = vmatprep.subr.bf16.mxu1 %v1571_v30 }
 0x15c   :  { %984 = vmatpush3.bf16.msra.mxu0 %v1076_v35 }
 0x15d   :  { %996 = vmatpush3.bf16.msra.mxu1 %v1077_v36  ;;  %1001 = vmatprep.subr.bf16.mxu0 %v1571_v30 }
 0x15e   :  { %1013 = vmatprep.subr.bf16.mxu1 %v1571_v30 }
 0x1dc   :  { %v284_v8 = vpop.xlane.xlu1 %283  ;;  %v278_v9 = vpop.xlane.xlu0 %277 }
 0x1dd   :  { %v288_v10 = vadd.f32 %v284_v8, %v278_v9  ;;  %v922_v9 = vld [vmem:[#allocation16] ss:$0 sm:$0xff] }
 0x1df   :  { %v290_v11 = vmul.f32 0.0078125, %v288_v10 }
 0x1e0   :  { %v287_v12 = vpop.xlane.xlu1 %286  ;;  %v281_v13 = vpop.xlane.xlu0 %280 }
 0x1e1   :  { %v292_v14 = vsub.f32 %v271_v1, %v290_v11  ;;  %v294_v15 = vsub.f32 %v273_v0, %v290_v11  ;;  %v289_v16 = vadd.f32 %v287_v12, %v281_v13  ;;  %v1078_v1 = vld [vmem:[#allocation17] sm:$0xff]  }
 0x1e3   :  { %v291_v17 = vmul.f32 0.0078125, %v289_v16  ;;  %v296_v18 = vmul.f32 %v292_v14, %v292_v14  ;;  %v304_v22 = vmul.f32 %v294_v15, %v294_v15 }
 0x1e5   :  { %v293_v19 = vsub.f32 %v272_v5, %v291_v17  ;;  %v295_v20 = vsub.f32 %v274_v2, %v291_v17  ;;  %v298_v21 = vsel %vm275_vm0, %v296_v18, 0.0  ;;  %v306_v24 = vsel %vm275_vm0, %v304_v22, 0.0  ;;  %v1080_v5 = vld [vmem:[#allocation17 + $0x10] sm:$0xff]  }
 0x1e6   :  { %299 = vadd.xlane.f32.xlu0 %v298_v21 }
 0x1e7   :  { %v297_v23 = vmul.f32 %v293_v19, %v293_v19  ;;  %v305_v26 = vmul.f32 %v295_v20, %v295_v20 }
 0x1e9   :  { %v301_v25 = vsel %vm275_vm0, %v297_v23, 0.0  ;;  %v309_v27 = vsel %vm275_vm0, %v305_v26, 0.0  ;;  %v1082_v23 = vld [vmem:[#allocation20] sm:$0xff]   ;;  %v1085_v26 = vld [vmem:[#allocation20 + $0x18] sm:$0xff]  }
 0x1ea   :  { %307 = vadd.xlane.f32.xlu0 %v306_v24  ;;  %302 = vadd.xlane.f32.xlu1 %v301_v25  ;;  %v1083_v24 = vld [vmem:[#allocation20 + $0x8] sm:$0xff]   ;;  %v1084_v25 = vld [vmem:[#allocation20 + $0x10] sm:$0xff]  }
 0x1ee   :  { %310 = vadd.xlane.f32.xlu1 %v309_v27  ;;  %v1086_v27 = vld [vmem:[#allocation20 + $0x20] sm:$0xff]  }
 0x273   :  { %v300_v37 = vpop.xlane.xlu0 %299 }
 0x277   :  { %v303_v38 = vpop.xlane.xlu1 %302  ;;  %v308_v39 = vpop.xlane.xlu0 %307 }
 0x278   :  { %v312_v40 = vadd.f32 %v308_v39, %v300_v37 }
 0x27a   :  { %v314_v41 = vmul.f32 0.0078125, %v312_v40 }
 0x27b   :  { %v311_v42 = vpop.xlane.xlu1 %310 }
 0x27c   :  { %v316_v43 = vadd.f32 1e-05, %v314_v41  ;;  %v313_v44 = vadd.f32 %v311_v42, %v303_v38  ;;  %v1090_v42 = vld [vmem:[#allocation26] sm:$0xff]  }
 0x27e   :  { %1094 = vrsqrt.f32 %v316_v43  ;;  %v315_v45 = vmul.f32 0.0078125, %v313_v44  ;;  %v1091_v43 = vld [vmem:[#allocation26 + $0x8] sm:$0xff]   ;;  %v1092_v44 = vld [vmem:[#allocation26 + $0x10] sm:$0xff]  }
 0x280   :  { %v317_v46 = vadd.f32 1e-05, %v315_v45  ;;  %v1093_v45 = vld [vmem:[#allocation26 + $0x18] sm:$0xff]  }
 0x282   :  { %1096 = vrsqrt.f32 %v317_v46  ;;  %v923_v46 = vld [vmem:[#allocation19] ss:$0 sm:$0xff] }
 0x288   :  { %v1095_v47 = vpop.eup %1094 }
 0x289   :  { %v320_v48 = vmul.f32 %v1095_v47, %v292_v14  ;;  %v340_v49 = vmul.f32 %v1095_v47, %v294_v15 }
 0x28b   :  { %v349_v55 = vmul.f32 %v910_v50, %v340_v49  ;;  %v329_v56 = vmul.f32 %v908_v51, %v320_v48 }
 0x28c   :  { %v1097_v52 = vpop.eup %1096 }
 0x28d   :  { %v321_v53 = vmul.f32 %v1097_v52, %v293_v19  ;;  %v341_v54 = vmul.f32 %v1097_v52, %v295_v20  ;;  %v358_v61 = vadd.f32 %v911_v57, %v349_v55  ;;  %v338_v63 = vadd.f32 %v909_v58, %v329_v56 }
 0x28f   :  { %v350_v59 = vmul.f32 %v910_v50, %v341_v54  ;;  %v330_v60 = vmul.f32 %v908_v51, %v321_v53 }
 0x291   :  { %v359_v62 = vadd.f32 %v911_v57, %v350_v59  ;;  %v339_v0 = vadd.f32 %v909_v58, %v330_v60  ;;  %v940_v60 = vld [vmem:[#allocation23] ss:$0 sm:$0xff] }
 0x293   :  { %v369_v2 = vpack.c.bf16 %v359_v62, %v358_v61  ;;  %v360_v3 = vpack.c.bf16 %v339_v0, %v338_v63 }
 0x295   :  { %986 = vmatmul.mubr.msk.bf16.vlgmr.msra.gmra.mrb[0].mxu0 %vm275_vm0, %v369_v2  ;;  %998 = vmatmul.mubr.msk.bf16.vlgmr.msra.gmra.mrb[0].mxu1 %vm275_vm0, %v360_v3 }
 0x296   :  { %1002 = vmatpush3.bf16.msra.mxu0 %v1078_v1  ;;  %1009 = vmatprep.mubr.msk.bf16.mxu0 %vm1572_vm1, %v1571_v30  ;;  %v941_v1 = vld [vmem:[#allocation25] ss:$0 sm:$0xff] }
 0x297   :  { %1003 = vmatprep.subr.bf16.mxu0 %v1571_v30  ;;  %1029 = vmatprep.mubr.msk.bf16.mxu1 %vm1572_vm1, %v1571_v30 }
 0x298   :  { %1014 = vmatpush3.bf16.msra.mxu1 %v1082_v23 }
 0x299   :  { %1015 = vmatprep.subr.bf16.mxu1 %v1571_v30 }
 0x29a   :  { %1004 = vmatpush3.bf16.msra.mxu0 %v1079_v4 }
 0x29b   :  { %1005 = vmatprep.subr.bf16.mxu0 %v1571_v30 }
 0x29c   :  { %1016 = vmatpush3.bf16.msra.mxu1 %v1083_v24 }
 0x29d   :  { %1017 = vmatprep.subr.bf16.mxu1 %v1571_v30 }
 0x29e   :  { %1006 = vmatpush3.bf16.msra.mxu0 %v1080_v5 }
 0x29f   :  { %1007 = vmatprep.subr.bf16.mxu0 %v1571_v30 }
 0x2a0   :  { %1018 = vmatpush3.bf16.msra.mxu1 %v1084_v25 }
 0x2a1   :  { %1019 = vmatprep.subr.bf16.mxu1 %v1571_v30 }
 0x2a2   :  { %1008 = vmatpush3.bf16.msra.mxu0 %v1081_v6 }
 0x2a3   :  { %1033 = vmatprep.subr.bf16.mxu0 %v1571_v30 }
 0x2a4   :  { %1020 = vmatpush3.bf16.msra.mxu1 %v1085_v26 }
 0x2a5   :  { %1021 = vmatprep.subr.bf16.mxu1 %v1571_v30 }
 0x2a8   :  { %1022 = vmatpush3.bf16.msra.mxu1 %v1086_v27 }
 0x2a9   :  { %1023 = vmatprep.subr.bf16.mxu1 %v1571_v30 }
 0x2ac   :  { %1024 = vmatpush3.bf16.msra.mxu1 %v1087_v28 }
 0x2ad   :  { %1025 = vmatprep.subr.bf16.mxu1 %v1571_v30 }
 0x2b0   :  { %1026 = vmatpush3.bf16.msra.mxu1 %v1088_v29 }
 0x2b1   :  { %1027 = vmatprep.subr.bf16.mxu1 %v1571_v30 }
 0x2b4   :  { %1028 = vmatpush3.bf16.msra.mxu1 %v1089_v31 }
 0x368   :  { %v439_v7 = vpop.f32.mrb[0].mxu0  ;;  %v507_v8 = vpop.f32.mrb[0].mxu1 }
 0x369   :  { %v508_v10 = vadd.f32 %v507_v8, %v439_v7  ;;  %v987_v11 = vpop.f32.mrb[1].mxu0  ;;  %v999_v12 = vpop.f32.mrb[1].mxu1 }
 0x36a   :  { %v442_v13 = vpop.f32.mrb[2].mxu0  ;;  %v510_v14 = vpop.f32.mrb[2].mxu1 }
 0x36b   :  { %v521_v15 = vadd.f32 %v922_v9, %v508_v10  ;;  %v511_v16 = vadd.f32 %v510_v14, %v442_v13  ;;  %v988_v17 = vpop.f32.mrb[3].mxu0  ;;  %v1000_v18 = vpop.f32.mrb[3].mxu1 }
 0x36d   :  { %v522_v19 = vadd.f32 %v922_v9, %v511_v16  ;;  %v732_v20 = vsel %vm275_vm0, %v521_v15, 0.0 }
 0x36e   :  { %733 = vadd.xlane.f32.xlu0 %v732_v20 }
 0x36f   :  { %v523_v21 = vpack.c.bf16 %v522_v19, %v521_v15  ;;  %v735_v22 = vsel %vm275_vm0, %v522_v19, 0.0 }
 0x370   :  { %736 = vadd.xlane.f32.xlu1 %v735_v22 }
 0x371   :  { %1010 = vmatmul.mubr.msk.bf16.vlgmr.msra.gmra.mrb[4].mxu0 %vm275_vm0, %v523_v21 }
 0x372   :  { %1041 = vmatprep.mubr.msk.bf16.mxu0 %vm1572_vm1, %v1571_v30  ;;  %1034 = vmatpush3.bf16.msra.mxu0 %v1090_v42 }
 0x373   :  { %1035 = vmatprep.subr.bf16.mxu0 %v1571_v30 }
 0x376   :  { %1036 = vmatpush3.bf16.msra.mxu0 %v1091_v43 }
 0x377   :  { %1037 = vmatprep.subr.bf16.mxu0 %v1571_v30 }
 0x37a   :  { %1038 = vmatpush3.bf16.msra.mxu0 %v1092_v44 }
 0x37b   :  { %1039 = vmatprep.subr.bf16.mxu0 %v1571_v30 }
 0x37e   :  { %1040 = vmatpush3.bf16.msra.mxu0 %v1093_v45 }
 0x3fb   :  { %v734_v32 = vpop.xlane.xlu0 %733 }
 0x3fc   :  { %v739_v33 = vmul.f32 0.015625, %v734_v32 }
 0x3fd   :  { %v737_v34 = vpop.xlane.xlu1 %736 }
 0x3fe   :  { %v741_v35 = vsub.f32 %v521_v15, %v739_v33  ;;  %v740_v36 = vmul.f32 0.015625, %v737_v34 }
 0x400   :  { %v742_v37 = vsub.f32 %v522_v19, %v740_v36  ;;  %v743_v38 = vmul.f32 %v741_v35, %v741_v35 }
 0x402   :  { %v745_v39 = vsel %vm275_vm0, %v743_v38, 0.0  ;;  %v744_v40 = vmul.f32 %v742_v37, %v742_v37 }
 0x403   :  { %746 = vadd.xlane.f32.xlu0 %v745_v39 }
 0x404   :  { %v748_v41 = vsel %vm275_vm0, %v744_v40, 0.0 }
 0x405   :  { %749 = vadd.xlane.f32.xlu1 %v748_v41 }
 0x444   :  { %v600_v47 = vpop.f32.mrb[4].mxu0 }
 0x445   :  { %v601_v48 = vadd.f32 %v923_v46, %v600_v47  ;;  %v1011_v49 = vpop.f32.mrb[5].mxu0 }
 0x446   :  { %v603_v50 = vpop.f32.mrb[6].mxu0 }
 0x447   :  { %865 = vst [vmem:[#allocation30] sm:$0xff] %v601_v48  ;;  %v604_v51 = vadd.f32 %v923_v46, %v603_v50  ;;  %v1012_v52 = vpop.f32.mrb[7].mxu0 }
 0x449   :  { %v607_v53 = vpack.c.bf16 %v604_v51, %v601_v48  ;;  %866 = vst [vmem:[#allocation30 + $0x8] sm:$0xff] %v604_v51 }
 0x44b   :  { %1030 = vmatmul.mubr.bf16.vlgmr.msra.gmra.mrb[4].mxu1 %v607_v53 }
 0x490   :  { %v747_v54 = vpop.xlane.xlu0 %746 }
 0x491   :  { %v751_v55 = vmul.f32 0.015625, %v747_v54 }
 0x492   :  { %v750_v56 = vpop.xlane.xlu1 %749 }
 0x493   :  { %v753_v57 = vadd.f32 1e-05, %v751_v55  ;;  %v752_v58 = vmul.f32 0.015625, %v750_v56 }
 0x495   :  { %1098 = vrsqrt.f32 %v753_v57  ;;  %v754_v30 = vadd.f32 1e-05, %v752_v58 }
 0x497   :  { %1100 = vrsqrt.f32 %v754_v30 }
 0x49f   :  { %v1099_v59 = vpop.eup %1098 }
 0x4a0   :  { %v757_v61 = vmul.f32 %v1099_v59, %v741_v35 }
 0x4a1   :  { %v1101_v62 = vpop.eup %1100 }
 0x4a2   :  { %v766_v63 = vmul.f32 %v940_v60, %v757_v61  ;;  %v758_v0 = vmul.f32 %v1101_v62, %v742_v37 }
 0x4a4   :  { %v767_v2 = vmul.f32 %v940_v60, %v758_v0  ;;  %v775_v3 = vadd.f32 %v941_v1, %v766_v63 }
 0x4a6   :  { %v776_v4 = vadd.f32 %v941_v1, %v767_v2 }
 0x4a8   :  { %v777_v5 = vpack.c.bf16 %v776_v4, %v775_v3 }
 0x4aa   :  { %1042 = vmatmul.mubr.msk.bf16.vlgmr.msra.gmra.mrb[8].mxu0 %vm275_vm0, %v777_v5 }
 0x4ab   :  { %1495 = shalt.err (!%p1492_p0)
}
 0x4ac   :  { %s1496_s4 = scalar_lea.hbm %s2001_s18, 256 }
 0x4ad   :  { %p1497_p1 = scmp.ne.s32.totalorder %s2001_s18, %s1496_s4  ;;  %p1500_p2 = scmp.lt.u32.totalorder %s1496_s4, %s2001_s18 }
 0x4af   :  { %p1502_p3 = pnand %p1500_p2, %p1497_p1 }
 0x4b1   :  { %1505 = shalt.err (!%p1502_p3)
}
 0x4b2   :  { %890 = dma.vmem_to_hbm [thread:$0]  %s885_s15, 256, %s2001_s18, [#allocation31], %s1552_s25, %s1552_s25, %s1553_s26   ;;  %v929_v10 = vld [vmem:[#allocation22] ss:$0 sm:$0xff]  ;;  %v942_v19 = vld [vmem:[#allocation28] ss:$0 sm:$0xff] }
 0x4b3   :  { %s1574_s18 = smov [#allocation29]  }
 0x4b4   :  { %s872_s12 = sshll.u32 %s1574_s18, 4  ;;  %s873_s12 = int_to_ptr.vmem [resolvable:$true] %s872_s12 }
 0x4b5   :  { %s1506_s9 = scalar_lea.vmem %s873_s12, 256  ;;  %p1511_p5 = scmp.lt.s32.totalorder %s873_s12, %s873_s12 }
 0x4b6   :  { %p1507_p4 = scmp.ne.s32.totalorder %s873_s12, %s1506_s9  ;;  %p1512_p6 = scmp.lt.s32.totalorder %s1506_s9, %s1506_s9 }
 0x4b8   :  { %p1513_p7 = por %p1512_p6, %p1511_p5 }
 0x4ba   :  { %p1514_p8 = pnand %p1513_p7, %p1507_p4 }
 0x51e   :  { %v713_v6 = vpop.f32.mrb[4].mxu1 }
 0x51f   :  { %v1031_v7 = vpop.f32.mrb[5].mxu1  ;;  %v714_v11 = vadd.f32 %v929_v10, %v713_v6 }
 0x520   :  { %v716_v8 = vpop.f32.mrb[6].mxu1 }
 0x521   :  { %v1032_v9 = vpop.f32.mrb[7].mxu1  ;;  %v717_v12 = vadd.f32 %v929_v10, %v716_v8  ;;  %v938_v13 = vmul.f32 -1.442695, %v714_v11 }
 0x523   :  { %v939_v14 = vmul.f32 -1.442695, %v717_v12  ;;  %1102 = vpow2.f32 %v938_v13 }
 0x525   :  { %1104 = vpow2.f32 %v939_v14 }
 0x52d   :  { %v1103_v15 = vpop.eup %1102 }
 0x52e   :  { %v726_v17 = vadd.f32 1.0, %v1103_v15 }
 0x52f   :  { %v1105_v16 = vpop.eup %1104 }
 0x530   :  { %v727_v18 = vadd.f32 1.0, %v1105_v16  ;;  %1106 = vrcp.f32 %v726_v17 }
 0x532   :  { %1108 = vrcp.f32 %v727_v18 }
 0x53a   :  { %v1107_v23 = vpop.eup %1106 }
 0x53c   :  { %v1109_v28 = vpop.eup %1108 }
 0x57d   :  { %v854_v20 = vpop.f32.mrb[8].mxu0 }
 0x57e   :  { %v855_v21 = vadd.f32 %v942_v19, %v854_v20  ;;  %v1043_v22 = vpop.f32.mrb[9].mxu0 }
 0x57f   :  { %v857_v24 = vpop.f32.mrb[10].mxu0 }
 0x580   :  { %v861_v25 = vmul.f32 %v1107_v23, %v855_v21  ;;  %v858_v26 = vadd.f32 %v942_v19, %v857_v24  ;;  %v1044_v27 = vpop.f32.mrb[11].mxu0 }
 0x582   :  { %863 = vst [vmem:[#allocation29] sm:$0xff] %v861_v25  ;;  %v862_v29 = vmul.f32 %v1109_v28, %v858_v26 }
 0x584   :  { %864 = vst [vmem:[#allocation29 + $0x8] sm:$0xff] %v862_v29 }
 0x585   :  { %1517 = shalt.err (!%p1514_p8)
}
 0x586   :  { %s1518_s28 = scalar_lea.hbm %s2000_s17, 256 }
 0x587   :  { %p1519_p9 = scmp.ne.s32.totalorder %s2000_s17, %s1518_s28  ;;  %p1522_p10 = scmp.lt.u32.totalorder %s1518_s28, %s2000_s17 }
 0x589   :  { %p1524_p11 = pnand %p1522_p10, %p1519_p9 }
 0x58b   :  { %1527 = shalt.err (!%p1524_p11)
}
 0x58c   :  { %878 = dma.vmem_to_hbm [thread:$0]  %s873_s12, 256, %s2000_s17, [#allocation4], %s1552_s25, %s1552_s25, %s1553_s26  }
 0x58d   :  { %1546 = dma.done.wait [#allocation4], 256  }
 0x58e   :  { %1547 = vsyncadd [#allocation4], 4294967040 }
 0x58f   :  { %1548 = dma.done.wait [#allocation31], 256  }
 0x590   :  { %1549 = vsyncadd [#allocation31], 4294967040 }
 0x591   :  { %897 = vsyncpa [#allocation3], 1 }
 0x592   :  { %898 = vsyncpa [#allocation6], 1 }
 0x593   :  { %899 = vsyncpa [#allocation9], 1 }
 0x594   :  { %900 = vsyncpa [#allocation12], 1 }
 0x595   :  { %901 = vsyncpa [#allocation15], 1 }
 0x596   :  { %902 = vsyncpa [#allocation18], 1 }
 0x597   :  { %903 = vsyncpa [#allocation21], 1 }
 0x598   :  { %904 = vsyncpa [#allocation24], 1 }
 0x599   :  { %905 = vsyncpa [#allocation27], 1 }
 0x59a   :  { %906 = vsyncpa [#allocation4], 1 }
 0x59b   :  { %907 = vsyncpa [#allocation31], 1 }

</bundles_post_ra>
